<compile_context>
chip_gen: v5e
topology: v5e:2x2
jax: 0.10.0
libtpu: 0.0.40
codegen_flags: <defaults>
</compile_context>

<pallas_src>
import functools

import jax
import jax.numpy as jnp
from jax.experimental import pallas as pl
from jax.experimental.pallas import tpu as pltpu

NEG_SLOPE = 0.01  # torch.nn.LeakyReLU default negative_slope


def _leaky_relu(x):
    return jnp.where(x > 0, x, x * NEG_SLOPE)


def _mlp_reward_kernel(seed_ref,                                   # scalar prefetch (SMEM)
                       x_ref,
                       w1_ref, b1_ref, w2_ref, b2_ref,
                       w3_ref, b3_ref, w4_ref, b4_ref,
                       o_ref,
                       *, p, training, ew_dtype):
    cdt = w1_ref.dtype  # MXU compute dtype (bf16 production path, f32 parity path)

    apply_dropout = training and p > 0.0
    if apply_dropout and p < 1.0:
        # Two independent seed words (caller seed, batch-tile id) -> distinct streams
        # per tile without aliasing across nearby caller seeds.
        pltpu.prng_seed(seed_ref[0], pl.program_id(0))
        thr = jnp.uint32(min(int(round(p * (2.0 ** 32))), 2 ** 32 - 1))
        inv_keep = 1.0 / (1.0 - p)          # python float -> weak-typed, keeps h's dtype

    def dropout(h):
        if not apply_dropout:
            return h
        if p >= 1.0:                         # torch Dropout(p=1) zeroes everything
            return jnp.zeros_like(h)
        bits = pltpu.prng_random_bits(h.shape)
        if bits.dtype != jnp.uint32:
            bits = pltpu.bitcast(bits, jnp.uint32)
        # keep with prob (1 - p): raw integer threshold compare, single select.
        return jnp.where(bits >= thr, h * inv_keep, 0.0)

    x = x_ref[...].astype(cdt)   # no-op when the producer already streams bf16

    h = jnp.dot(x, w1_ref[...], preferred_element_type=jnp.float32) + b1_ref[...]
    h = dropout(_leaky_relu(h.astype(ew_dtype)))

    h = jnp.dot(h.astype(cdt), w2_ref[...], preferred_element_type=jnp.float32) + b2_ref[...]
    h = dropout(_leaky_relu(h.astype(ew_dtype)))

    h = jnp.dot(h.astype(cdt), w3_ref[...], preferred_element_type=jnp.float32) + b3_ref[...]
    h = dropout(_leaky_relu(h.astype(ew_dtype)))

    # Final Linear(hidden, 1): contract w4 (1,H) against h (tb,H) on H, yielding the
    # lane-dense (1, tb) row directly (unmasked full-lane stores, no masked (tb,1)).
    # TODO(synk): confirm in the Mosaic bundle dump that this transposed-RHS matmul does
    # not materialize an XLU transpose of h; if it does, switch to jnp.dot(h, w4_col)
    # -> (tb,1) plus a tiny (tb,1)->(1,tb) relayout before the store.
    r = jax.lax.dot_general(w4_ref[...], h.astype(cdt),
                            dimension_numbers=(((1,), (1,)), ((), ())),
                            preferred_element_type=jnp.float32)          # (1, tb)
    o_ref[...] = (r + b4_ref[0]).astype(o_ref.dtype)


# --------------------------------------------------------------------------------------
# Params / helpers
# --------------------------------------------------------------------------------------
def init_params(key, input_dim, hidden_dim, dtype=jnp.float32):
    """torch.nn.Linear-style init, U(+-1/sqrt(fan_in)).

    Weights stored as (in, out); the last layer's (hidden, 1) weight is stored as a
    (1, hidden) row (its transpose), bias as (1,)."""
    shapes = [((input_dim, hidden_dim), (1, hidden_dim)),
              ((hidden_dim, hidden_dim), (1, hidden_dim)),
              ((hidden_dim, hidden_dim), (1, hidden_dim))]
    params = []
    for (ws, bs) in shapes:
        key, kw, kb = jax.random.split(key, 3)
        bound = 1.0 / (ws[0] ** 0.5)
        params.append(jax.random.uniform(kw, ws, dtype, -bound, bound))
        params.append(jax.random.uniform(kb, bs, dtype, -bound, bound))
    key, kw, kb = jax.random.split(key, 3)
    bound = 1.0 / (hidden_dim ** 0.5)
    params.append(jax.random.uniform(kw, (1, hidden_dim), dtype, -bound, bound))  # w4 row
    params.append(jax.random.uniform(kb, (1,), dtype, -bound, bound))             # b4
    return tuple(params)


def _round_up(v, m):
    return ((v + m - 1) // m) * m


def _pad2d(a, rows, cols):
    pr, pc = rows - a.shape[0], cols - a.shape[1]
    return a if (pr == 0 and pc == 0) else jnp.pad(a, ((0, pr), (0, pc)))


def _tpu_defaults():
    """(tb, vmem_limit_bytes) per generation: 128 MiB parts (v5e/v6e) vs 64 MiB (v7x)."""
    try:
        vmem_cap = pltpu.get_tpu_info().vmem_capacity_bytes
    except Exception:
        vmem_cap = None
    if vmem_cap is not None and vmem_cap >= 100 * 1024 * 1024:   # v5e / v6e (128 MiB)
        return 1024, 100 * 1024 * 1024
    if vmem_cap is not None:                                     # v7x (64 MiB)
        return 512, 52 * 1024 * 1024
    return 512, 48 * 1024 * 1024                                 # unknown: conservative


def _is_v5e():
    try:
        kind = jax.devices()[0].device_kind.lower()
    except Exception:
        return False
    return ("v5 lite" in kind) or ("v5e" in kind) or ("v5lite" in kind)


# --------------------------------------------------------------------------------------
# Forward
# --------------------------------------------------------------------------------------
def mlp_reward_forward(x, params, *, p=0.5, training=False, seed=0,
                       tb=None, compute_dtype=jnp.bfloat16,
                       vmem_limit_bytes=None, pad_features=True):
    """Pallas forward pass. x: (N, input_dim) -> rewards (N, 1).

    compute_dtype=jnp.float32 is a parity/test path (v5e/v6e MXU has no native f32);
    production calls should keep the bf16 default and ideally stream x in bf16."""
    N, D = x.shape
    w1, b1, w2, b2, w3, b3, w4, b4 = params
    H = w1.shape[1]

    tb_default, vmem_default = _tpu_defaults()
    if tb is None:
        tb = tb_default
    if vmem_limit_bytes is None:
        vmem_limit_bytes = vmem_default

    # Elementwise dtype: bf16 on v6e/v7x (2 elems per lane slot), f32 on v5e (no bf16
    # VALU) and on the exact f32 parity path.
    if compute_dtype == jnp.float32 or _is_v5e():
        ew_dtype = jnp.float32
    else:
        ew_dtype = compute_dtype

    # ---- feature / hidden padding to lane width (one-time param transform).  In
    # production, hoist this out of the per-call path and hand over x already padded
    # and in bf16 (no wrapper-side round trip). -------------------------------------
    D_pad = _round_up(D, 128) if pad_features else D
    H_pad = _round_up(H, 128) if pad_features else H

    w1c = _pad2d(w1, D_pad, H_pad).astype(compute_dtype)
    w2c = _pad2d(w2, H_pad, H_pad).astype(compute_dtype)
    w3c = _pad2d(w3, H_pad, H_pad).astype(compute_dtype)
    w4c = _pad2d(w4, 1, H_pad).astype(compute_dtype)
    b1c = _pad2d(b1, 1, H_pad).astype(jnp.float32)
    b2c = _pad2d(b2, 1, H_pad).astype(jnp.float32)
    b3c = _pad2d(b3, 1, H_pad).astype(jnp.float32)
    b4c = b4.astype(jnp.float32).reshape((1,))

    # ---- rough VMEM budget: resident weights + x pipeline buffers + intermediates ----
    x_itemsize = jnp.dtype(x.dtype).itemsize
    w_itemsize = jnp.dtype(compute_dtype).itemsize
    weight_bytes = (w_itemsize * (D_pad * H_pad + 2 * H_pad * H_pad + H_pad)
                    + 4 * (3 * H_pad + 1))

    def _vmem_budget(t):
        return (weight_bytes
                + 3 * t * D_pad * x_itemsize          # up to 3-deep x pipeline
                + 2 * t * H_pad * 4                   # f32 matmul output + working copy
                + 4 * t * 4)                          # output row (double buffered)

    # ---- batch tiling: keep >= 2 tiles for N >= 256 so v7x's two TCs both run -------
    if N < 256:
        tb_eff = N                                    # single tile: block == full array
    else:
        tb_eff = min(tb, _round_up((N + 1) // 2, 128))
        tb_eff = max(128, (tb_eff // 128) * 128)
        while tb_eff > 128 and _vmem_budget(tb_eff) > int(0.8 * vmem_limit_bytes):
            tb_eff = max(128, (tb_eff // 2 // 128) * 128)
        if _vmem_budget(tb_eff) > int(0.8 * vmem_limit_bytes):
            # TODO(synk): for hidden_dim large enough that resident bf16 weights overflow
            # v7x's 64 MiB VMEM (H ~ 3k+), add a hidden-dim grid axis and tile w2/w3
            # along K with an f32 accumulator instead of keeping all weights resident.
            pass
    n_pad = N if tb_eff >= N else _round_up(N, tb_eff)
    num_tiles = max(1, n_pad // tb_eff)

    pad_rows, pad_cols = n_pad - N, D_pad - D
    x_p = x if (pad_rows == 0 and pad_cols == 0) else jnp.pad(x, ((0, pad_rows), (0, pad_cols)))

    # ---- pipelining modes ------------------------------------------------------------
    on_tpu = jax.default_backend() == "tpu"
    single_buf = pl.Buffered(1) if on_tpu else None        # weights: fetched once
    x_buf_mode = None
    if on_tpu and num_tiles > 1:
        x_buf_mode = pl.Buffered(3 if num_tiles >= 3 else 2)

    const = lambda i, seed_ref: (0, 0)

    def wspec(shape):
        return pl.BlockSpec(shape, const, pipeline_mode=single_buf)

    kernel = functools.partial(_mlp_reward_kernel, p=float(p),
                               training=bool(training), ew_dtype=ew_dtype)
    seed_arr = jnp.asarray([seed], dtype=jnp.int32)

    out_slab = pl.pallas_call(
        kernel,
        out_shape=jax.ShapeDtypeStruct((1, n_pad), x.dtype),
        grid_spec=pltpu.PrefetchScalarGridSpec(
            num_scalar_prefetch=1,
            grid=(num_tiles,),
            in_specs=[
                pl.BlockSpec((tb_eff, D_pad), lambda i, seed_ref: (i, 0),
                             pipeline_mode=x_buf_mode),               # x tile (streamed)
                wspec((D_pad, H_pad)), wspec((1, H_pad)),              # layer 1
                wspec((H_pad, H_pad)), wspec((1, H_pad)),              # layer 2
                wspec((H_pad, H_pad)), wspec((1, H_pad)),              # layer 3
                wspec((1, H_pad)),                                     # layer 4 weight row
                pl.BlockSpec(memory_space=pltpu.MemorySpace.SMEM),     # b4 scalar in SMEM
            ],
            out_specs=pl.BlockSpec((1, tb_eff), lambda i, seed_ref: (0, i)),  # lane-dense
        ),
        compiler_params=pltpu.CompilerParams(
            dimension_semantics=("parallel",),            # batch tiles are independent
            vmem_limit_bytes=int(vmem_limit_bytes),
        ),
    )(seed_arr, x_p, w1c, b1c, w2c, b2c, w3c, b3c, w4c, b4c)

    return out_slab.reshape(n_pad, 1)[:N]


def _reference_forward(x, params):
    """Pure-JAX eval-mode reference (dropout = identity), f32."""
    w1, b1, w2, b2, w3, b3, w4, b4 = params
    h = _leaky_relu(x @ w1 + b1)
    h = _leaky_relu(h @ w2 + b2)
    h = _leaky_relu(h @ w3 + b3)
    return h @ w4.T + b4[None, :]


if __name__ == "__main__":
    key = jax.random.PRNGKey(0)
    kx, kx2, kp = jax.random.split(key, 3)

    batch, input_dim, hidden_dim = 8, 32, 32
    x = jax.random.normal(kx, (batch, input_dim), jnp.float32)
    params = init_params(kp, input_dim, hidden_dim)
    ref = _reference_forward(x, params)

    # Eval mode, exact f32 parity path (matches model.eval() / get_stable_rewards).
    out_f32 = jax.block_until_ready(
        mlp_reward_forward(x, params, p=0.5, training=False, compute_dtype=jnp.float32))
    assert out_f32.shape == (batch, 1), out_f32.shape
    assert jnp.allclose(out_f32, ref, atol=1e-4, rtol=1e-4), "f32 kernel mismatch"

    # Eval mode, production bf16 MXU path with x streamed in bf16 (producer-side cast).
    out_bf16 = jax.block_until_ready(
        mlp_reward_forward(x.astype(jnp.bfloat16), params, p=0.5, training=False))
    assert out_bf16.shape == (batch, 1)
    assert jnp.allclose(out_bf16.astype(jnp.float32), ref, atol=2e-1, rtol=2e-1), \
        "bf16 kernel mismatch"

    # Multi-tile ragged batch (>= 2 tiles): exercises grid parallelism, batch/feature
    # padding, deeper x pipelining and the lane-dense output slab.  Exact f32 path.
    n2 = 300
    x2 = jax.random.normal(kx2, (n2, input_dim), jnp.float32)
    ref2 = _reference_forward(x2, params)
    out2 = jax.block_until_ready(
        mlp_reward_forward(x2, params, training=False, compute_dtype=jnp.float32))
    assert out2.shape == (n2, 1)
    assert jnp.allclose(out2, ref2, atol=1e-4, rtol=1e-4), "multi-tile f32 mismatch"

    # Same multi-tile batch on the production bf16 configuration (bf16 x stream).
    out2_bf16 = jax.block_until_ready(
        mlp_reward_forward(x2.astype(jnp.bfloat16), params, training=False))
    assert out2_bf16.shape == (n2, 1)
    assert jnp.allclose(out2_bf16.astype(jnp.float32), ref2, atol=2.5e-1, rtol=2.5e-1), \
        "multi-tile bf16 mismatch"

    # Train-mode dropout uses the TPU hardware PRNG (pltpu.prng_*), which only lowers
    # under the Mosaic TPU backend.
    if jax.default_backend() == "tpu":
        out_tr = jax.block_until_ready(
            mlp_reward_forward(x, params, p=0.5, training=True, seed=1234))
        assert out_tr.shape == (batch, 1)

    print("KERNEL_OK")
</pallas_src>

<mosaic_0001>
module attributes {stable_mosaic.version = 11 : i64} {
  func.func @_mlp_reward_kernel(%arg0: i32, %arg1: memref<1xi32, #tpu.memory_space<smem>>, %arg2: memref<8x128xf32, #tpu.memory_space<vmem>>, %arg3: memref<128x128xf32, #tpu.memory_space<vmem>>, %arg4: memref<1x128xf32, #tpu.memory_space<vmem>>, %arg5: memref<128x128xf32, #tpu.memory_space<vmem>>, %arg6: memref<1x128xf32, #tpu.memory_space<vmem>>, %arg7: memref<128x128xf32, #tpu.memory_space<vmem>>, %arg8: memref<1x128xf32, #tpu.memory_space<vmem>>, %arg9: memref<1x128xf32, #tpu.memory_space<vmem>>, %arg10: memref<1xf32, #tpu.memory_space<smem>>, %arg11: memref<1x8xf32, #tpu.memory_space<vmem>>) attributes {dimension_semantics = [#tpu.dimension_semantics<parallel>], iteration_bounds = array<i64: 1>, scalar_prefetch = 1 : i64, scratch_operands = 0 : i64, tpu.core_type = #tpu.core_type<tc>, window_params = [{transform_indices = @transform_0, window_bounds = array<i64: 8, 128>}, {pipeline_mode = #tpu.pipeline_mode<synchronous>, transform_indices = @transform_1, window_bounds = array<i64: 128, 128>}, {pipeline_mode = #tpu.pipeline_mode<synchronous>, transform_indices = @transform_2, window_bounds = array<i64: 1, 128>}, {pipeline_mode = #tpu.pipeline_mode<synchronous>, transform_indices = @transform_3, window_bounds = array<i64: 128, 128>}, {pipeline_mode = #tpu.pipeline_mode<synchronous>, transform_indices = @transform_4, window_bounds = array<i64: 1, 128>}, {pipeline_mode = #tpu.pipeline_mode<synchronous>, transform_indices = @transform_5, window_bounds = array<i64: 128, 128>}, {pipeline_mode = #tpu.pipeline_mode<synchronous>, transform_indices = @transform_6, window_bounds = array<i64: 1, 128>}, {pipeline_mode = #tpu.pipeline_mode<synchronous>, transform_indices = @transform_7, window_bounds = array<i64: 1, 128>}, {transform_indices = @transform_8, window_bounds = array<i64: 1>}, {transform_indices = @transform_9, window_bounds = array<i64: 1, 8>}]} {
    %c0 = arith.constant 0 : index
    %c0_0 = arith.constant 0 : index
    %0 = vector.load %arg2[%c0, %c0_0] : memref<8x128xf32, #tpu.memory_space<vmem>>, vector<8x128xf32>
    %c0_1 = arith.constant 0 : index
    %c0_2 = arith.constant 0 : index
    %1 = vector.load %arg3[%c0_1, %c0_2] : memref<128x128xf32, #tpu.memory_space<vmem>>, vector<128x128xf32>
    %cst = arith.constant dense<0.000000e+00> : vector<8x128xf32>
    %2 = tpu.matmul %0, %1, %cst {dimension_numbers = #tpu.dot_dimension_numbers<[1], [0], [0], [1], [0, 0, 1, 1], [], []>} : vector<8x128xf32>, vector<128x128xf32>, vector<8x128xf32> -> vector<8x128xf32>
    %c0_3 = arith.constant 0 : index
    %c0_4 = arith.constant 0 : index
    %3 = vector.load %arg4[%c0_3, %c0_4] : memref<1x128xf32, #tpu.memory_space<vmem>>, vector<1x128xf32>
    %4 = vector.broadcast %3 : vector<1x128xf32> to vector<8x128xf32>
    %5 = arith.addf %2, %4 : vector<8x128xf32>
    %cst_5 = arith.constant 0.000000e+00 : f32
    %6 = vector.broadcast %cst_5 : f32 to vector<8x128xf32>
    %7 = arith.cmpf ogt, %5, %6 : vector<8x128xf32>
    %cst_6 = arith.constant 0.00999999977 : f32
    %8 = vector.broadcast %cst_6 : f32 to vector<8x128xf32>
    %9 = arith.mulf %5, %8 : vector<8x128xf32>
    %10 = arith.select %7, %5, %9 : vector<8x128xi1>, vector<8x128xf32>
    %c0_7 = arith.constant 0 : index
    %c0_8 = arith.constant 0 : index
    %11 = vector.load %arg5[%c0_7, %c0_8] : memref<128x128xf32, #tpu.memory_space<vmem>>, vector<128x128xf32>
    %cst_9 = arith.constant dense<0.000000e+00> : vector<8x128xf32>
    %12 = tpu.matmul %10, %11, %cst_9 {dimension_numbers = #tpu.dot_dimension_numbers<[1], [0], [0], [1], [0, 0, 1, 1], [], []>} : vector<8x128xf32>, vector<128x128xf32>, vector<8x128xf32> -> vector<8x128xf32>
    %c0_10 = arith.constant 0 : index
    %c0_11 = arith.constant 0 : index
    %13 = vector.load %arg6[%c0_10, %c0_11] : memref<1x128xf32, #tpu.memory_space<vmem>>, vector<1x128xf32>
    %14 = vector.broadcast %13 : vector<1x128xf32> to vector<8x128xf32>
    %15 = arith.addf %12, %14 : vector<8x128xf32>
    %cst_12 = arith.constant 0.000000e+00 : f32
    %16 = vector.broadcast %cst_12 : f32 to vector<8x128xf32>
    %17 = arith.cmpf ogt, %15, %16 : vector<8x128xf32>
    %cst_13 = arith.constant 0.00999999977 : f32
    %18 = vector.broadcast %cst_13 : f32 to vector<8x128xf32>
    %19 = arith.mulf %15, %18 : vector<8x128xf32>
    %20 = arith.select %17, %15, %19 : vector<8x128xi1>, vector<8x128xf32>
    %c0_14 = arith.constant 0 : index
    %c0_15 = arith.constant 0 : index
    %21 = vector.load %arg7[%c0_14, %c0_15] : memref<128x128xf32, #tpu.memory_space<vmem>>, vector<128x128xf32>
    %cst_16 = arith.constant dense<0.000000e+00> : vector<8x128xf32>
    %22 = tpu.matmul %20, %21, %cst_16 {dimension_numbers = #tpu.dot_dimension_numbers<[1], [0], [0], [1], [0, 0, 1, 1], [], []>} : vector<8x128xf32>, vector<128x128xf32>, vector<8x128xf32> -> vector<8x128xf32>
    %c0_17 = arith.constant 0 : index
    %c0_18 = arith.constant 0 : index
    %23 = vector.load %arg8[%c0_17, %c0_18] : memref<1x128xf32, #tpu.memory_space<vmem>>, vector<1x128xf32>
    %24 = vector.broadcast %23 : vector<1x128xf32> to vector<8x128xf32>
    %25 = arith.addf %22, %24 : vector<8x128xf32>
    %cst_19 = arith.constant 0.000000e+00 : f32
    %26 = vector.broadcast %cst_19 : f32 to vector<8x128xf32>
    %27 = arith.cmpf ogt, %25, %26 : vector<8x128xf32>
    %cst_20 = arith.constant 0.00999999977 : f32
    %28 = vector.broadcast %cst_20 : f32 to vector<8x128xf32>
    %29 = arith.mulf %25, %28 : vector<8x128xf32>
    %30 = arith.select %27, %25, %29 : vector<8x128xi1>, vector<8x128xf32>
    %c0_21 = arith.constant 0 : index
    %c0_22 = arith.constant 0 : index
    %31 = vector.load %arg9[%c0_21, %c0_22] : memref<1x128xf32, #tpu.memory_space<vmem>>, vector<1x128xf32>
    %cst_23 = arith.constant dense<0.000000e+00> : vector<1x8xf32>
    %32 = tpu.matmul %31, %30, %cst_23 {dimension_numbers = #tpu.dot_dimension_numbers<[1], [1], [0], [0], [0, 0, 1, 0], [], []>} : vector<1x128xf32>, vector<8x128xf32>, vector<1x8xf32> -> vector<1x8xf32>
    %c0_24 = arith.constant 0 : index
    %33 = memref.load %arg10[%c0_24] : memref<1xf32, #tpu.memory_space<smem>>
    %34 = vector.broadcast %33 : f32 to vector<1x8xf32>
    %35 = arith.addf %32, %34 : vector<1x8xf32>
    %c0_25 = arith.constant 0 : index
    %c0_26 = arith.constant 0 : index
    %36 = vector.load %arg11[%c0_25, %c0_26] : memref<1x8xf32, #tpu.memory_space<vmem>>, vector<1x8xf32>
    tpu.vector_store %arg11[%c0_25, %c0_26], %35 {strides = array<i32>} : memref<1x8xf32, #tpu.memory_space<vmem>>, vector<1x8xf32>,
    return
  }
  func.func @transform_0(%arg0: i32, %arg1: memref<1xi32, #tpu.memory_space<smem>>) -> (i32, i32) {
    %c0_i32 = arith.constant 0 : i32
    %c0_i32_0 = arith.constant 0 : i32
    return %arg0, %c0_i32 : i32, i32
  }
  func.func @transform_1(%arg0: i32, %arg1: memref<1xi32, #tpu.memory_space<smem>>) -> (i32, i32) {
    %c0_i32 = arith.constant 0 : i32
    %c0_i32_0 = arith.constant 0 : i32
    %c0_i32_1 = arith.constant 0 : i32
    return %c0_i32, %c0_i32_0 : i32, i32
  }
  func.func @transform_2(%arg0: i32, %arg1: memref<1xi32, #tpu.memory_space<smem>>) -> (i32, i32) {
    %c0_i32 = arith.constant 0 : i32
    %c0_i32_0 = arith.constant 0 : i32
    %c0_i32_1 = arith.constant 0 : i32
    return %c0_i32, %c0_i32_0 : i32, i32
  }
  func.func @transform_3(%arg0: i32, %arg1: memref<1xi32, #tpu.memory_space<smem>>) -> (i32, i32) {
    %c0_i32 = arith.constant 0 : i32
    %c0_i32_0 = arith.constant 0 : i32
    %c0_i32_1 = arith.constant 0 : i32
    return %c0_i32, %c0_i32_0 : i32, i32
  }
  func.func @transform_4(%arg0: i32, %arg1: memref<1xi32, #tpu.memory_space<smem>>) -> (i32, i32) {
    %c0_i32 = arith.constant 0 : i32
    %c0_i32_0 = arith.constant 0 : i32
    %c0_i32_1 = arith.constant 0 : i32
    return %c0_i32, %c0_i32_0 : i32, i32
  }
  func.func @transform_5(%arg0: i32, %arg1: memref<1xi32, #tpu.memory_space<smem>>) -> (i32, i32) {
    %c0_i32 = arith.constant 0 : i32
    %c0_i32_0 = arith.constant 0 : i32
    %c0_i32_1 = arith.constant 0 : i32
    return %c0_i32, %c0_i32_0 : i32, i32
  }
  func.func @transform_6(%arg0: i32, %arg1: memref<1xi32, #tpu.memory_space<smem>>) -> (i32, i32) {
    %c0_i32 = arith.constant 0 : i32
    %c0_i32_0 = arith.constant 0 : i32
    %c0_i32_1 = arith.constant 0 : i32
    return %c0_i32, %c0_i32_0 : i32, i32
  }
  func.func @transform_7(%arg0: i32, %arg1: memref<1xi32, #tpu.memory_space<smem>>) -> (i32, i32) {
    %c0_i32 = arith.constant 0 : i32
    %c0_i32_0 = arith.constant 0 : i32
    %c0_i32_1 = arith.constant 0 : i32
    return %c0_i32, %c0_i32_0 : i32, i32
  }
  func.func @transform_8(%arg0: i32, %arg1: memref<1xi32, #tpu.memory_space<smem>>) -> i32 {
    %c0_i32 = arith.constant 0 : i32
    %c0_i32_0 = arith.constant 0 : i32
    return %c0_i32 : i32
  }
  func.func @transform_9(%arg0: i32, %arg1: memref<1xi32, #tpu.memory_space<smem>>) -> (i32, i32) {
    %c0_i32 = arith.constant 0 : i32
    %c0_i32_0 = arith.constant 0 : i32
    return %c0_i32, %arg0 : i32, i32
  }
}

</mosaic_0001>

<bundles_post_ra>
// kernel: tpu_custom_call.1
= control target key start
LH: loop header
LB: loop body
LE: loop exit
PB: predicated region body
PF: predicated region fallthrough
CT: control target
= control target key end

     0   :  { %17 = vsyncpa [#allocation6], 0  ;;  %s501_s0 = inlined_call_operand.<no memory space> [shape: s32[1], index: 0, kind: input, shape index: {}]   ;;  %s502_s1 = inlined_call_operand.hbm [shape: f32[8,128], index: 1, kind: input, shape index: {}]   ;;  %s503_s2 = inlined_call_operand.hbm [shape: f32[128,128], index: 2, kind: input, shape index: {}]   ;;  %s504_s3 = inlined_call_operand.vmem [shape: f32[1,128], index: 3, kind: input, shape index: {}]   ;;  %s505_s4 = inlined_call_operand.hbm [shape: f32[128,128], index: 4, kind: input, shape index: {}]   ;;  %s506_s5 = inlined_call_operand.vmem [shape: f32[1,128], index: 5, kind: input, shape index: {}]   ;;  %s507_s6 = inlined_call_operand.hbm [shape: f32[128,128], index: 6, kind: input, shape index: {}]   ;;  %s508_s7 = inlined_call_operand.vmem [shape: f32[1,128], index: 7, kind: input, shape index: {}]   ;;  %s509_s8 = inlined_call_operand.vmem [shape: f32[1,128], index: 8, kind: input, shape index: {}]   ;;  %s510_s9 = inlined_call_operand.<no memory space> [shape: f32[1], index: 9, kind: input, shape index: {}]   ;;  %s511_s10 = inlined_call_operand.hbm [shape: f32[1,8], index: 10, kind: output, shape index: {}]  }
   0x1   :  { %18 = vsyncpa [#allocation9], 0 }
   0x2   :  { %19 = vsyncpa [#allocation12], 0  ;;  %s36_s14 = sshll.u32 %s503_s2, 4  ;;  %s37_s14 = int_to_ptr.hbm [resolvable:$true] %s36_s14 }
   0x3   :  { %20 = vsyncpa [#allocation7], 0  ;;  %s409_s15 = smov [#allocation8]   ;;  %s26_s19 = sshll.u32 %s502_s1, 4  ;;  %s27_s19 = int_to_ptr.hbm [resolvable:$true] %s26_s19 }
   0x4   :  { %s38_s16 = sshll.u32 %s409_s15, 4  ;;  %s410_s20 = smov 128   ;;  %s39_s16 = int_to_ptr.vmem [resolvable:$true] %s38_s16 }
   0x5   :  { %s411_s21 = smov 8   ;;  %s412_s22 = smov [#allocation5]  }
   0x6   :  { %44 = dma.hbm_to_vmem [thread:$0]  %s37_s14, 2048, %s39_s16, [#allocation9], %s410_s20, %s410_s20, %s411_s21  }
   0x7   :  { %s28_s23 = sshll.u32 %s412_s22, 4  ;;  %s51_s0 = sshll.u32 %s505_s4, 4  ;;  %s29_s23 = int_to_ptr.vmem [resolvable:$true] %s28_s23  ;;  %s52_s0 = int_to_ptr.hbm [resolvable:$true] %s51_s0 }
   0x8   :  { %31 = dma.hbm_to_vmem [thread:$0]  %s27_s19, 128, %s29_s23, [#allocation6]  }
   0x9   :  { %s66_s27 = sshll.u32 %s507_s6, 4  ;;  %s413_s28 = smov [#allocation10]   ;;  %s67_s27 = int_to_ptr.hbm [resolvable:$true] %s66_s27 }
   0xa   :  { %s53_s29 = sshll.u32 %s413_s28, 4  ;;  %s414_s1 = smov [#allocation11]   ;;  %s54_s29 = int_to_ptr.vmem [resolvable:$true] %s53_s29 }
   0xb   :  { %59 = dma.hbm_to_vmem [thread:$0]  %s52_s0, 2048, %s54_s29, [#allocation9], %s410_s20, %s410_s20, %s411_s21  }
   0xc   :  { %s68_s30 = sshll.u32 %s414_s1, 4  ;;  %s69_s30 = int_to_ptr.vmem [resolvable:$true] %s68_s30 }
   0xd   :  { %74 = dma.hbm_to_vmem [thread:$0]  %s67_s27, 2048, %s69_s30, [#allocation12], %s410_s20, %s410_s20, %s411_s21  }
   0xe   :  { %401 = dma.done.wait [#allocation6], 128  }
   0xf   :  { %402 = vsyncadd [#allocation6], 4294967168 }
  0x10   :  { %403 = dma.done.wait [#allocation9], 4096  }
  0x11   :  { %404 = vsyncadd [#allocation9], 4294963200 }
  0x12   :  { %405 = dma.done.wait [#allocation12], 2048  }
  0x13   :  { %406 = vsyncadd [#allocation12], 4294965248  ;;  %v113_v0 = vld [vmem:[#allocation8 + $0x78] sm:$0xff]  ;;  %v112_v1 = vld [vmem:[#allocation8 + $0x70] sm:$0xff]  ;;  %s415_s17 = smov [#allocation13]   ;;  %vm250_vm3 = vcmask 57344  }
  0x14   :  { %118 = vmatpush.msra.mxu0 %v113_v0  ;;  %v111_v2 = vld [vmem:[#allocation8 + $0x68] sm:$0xff]  ;;  %v110_v3 = vld [vmem:[#allocation8 + $0x60] sm:$0xff]  ;;  %v156_v4 = vld [vmem:[#allocation10 + $0x78] sm:$0xff]  ;;  %s257_s18 = sshll.u32 %s415_s17, 4  ;;  %s258_s18 = int_to_ptr.vmem [resolvable:$true] %s257_s18 }
  0x15   :  { %v109_v5 = vld [vmem:[#allocation8 + $0x58] sm:$0xff]  ;;  %161 = vmatpush.msra.mxu1 %v156_v4  ;;  %v155_v6 = vld [vmem:[#allocation10 + $0x70] sm:$0xff]  ;;  %v154_v7 = vld [vmem:[#allocation10 + $0x68] sm:$0xff] }
  0x16   :  { %119 = vmatpush.msra.mxu0 %v112_v1  ;;  %v108_v8 = vld [vmem:[#allocation8 + $0x50] sm:$0xff]  ;;  %v153_v9 = vld [vmem:[#allocation10 + $0x60] sm:$0xff]  ;;  %v107_v10 = vld [vmem:[#allocation8 + $0x48] sm:$0xff]  ;;  %v229_v1 = vstv %s510_s9 }
  0x17   :  { %162 = vmatpush.msra.mxu1 %v155_v6  ;;  %v152_v11 = vld [vmem:[#allocation10 + $0x58] sm:$0xff]  ;;  %v106_v12 = vld [vmem:[#allocation8 + $0x40] sm:$0xff]  ;;  %v151_v13 = vld [vmem:[#allocation10 + $0x50] sm:$0xff] }
  0x18   :  { %120 = vmatpush.msra.mxu0 %v111_v2  ;;  %v105_v14 = vld [vmem:[#allocation8 + $0x38] sm:$0xff]  ;;  %v150_v15 = vld [vmem:[#allocation10 + $0x48] sm:$0xff]  ;;  %v104_v16 = vld [vmem:[#allocation8 + $0x30] sm:$0xff] }
  0x19   :  { %163 = vmatpush.msra.mxu1 %v154_v7  ;;  %v149_v17 = vld [vmem:[#allocation10 + $0x40] sm:$0xff]  ;;  %v103_v18 = vld [vmem:[#allocation8 + $0x28] sm:$0xff]  ;;  %v148_v19 = vld [vmem:[#allocation10 + $0x38] sm:$0xff] }
  0x1a   :  { %121 = vmatpush.msra.mxu0 %v110_v3  ;;  %v102_v20 = vld [vmem:[#allocation8 + $0x20] sm:$0xff]  ;;  %v147_v21 = vld [vmem:[#allocation10 + $0x30] sm:$0xff]  ;;  %v101_v22 = vld [vmem:[#allocation8 + $0x18] sm:$0xff] }
  0x1b   :  { %164 = vmatpush.msra.mxu1 %v153_v9  ;;  %v146_v23 = vld [vmem:[#allocation10 + $0x28] sm:$0xff]  ;;  %v100_v24 = vld [vmem:[#allocation8 + $0x10] sm:$0xff]  ;;  %v145_v25 = vld [vmem:[#allocation10 + $0x20] sm:$0xff] }
  0x1c   :  { %122 = vmatpush.msra.mxu0 %v109_v5  ;;  %v99_v26 = vld [vmem:[#allocation8 + $0x8] sm:$0xff]  ;;  %v144_v27 = vld [vmem:[#allocation10 + $0x18] sm:$0xff]  ;;  %v98_v28 = vld [vmem:[#allocation8] sm:$0xff] }
  0x1d   :  { %165 = vmatpush.msra.mxu1 %v152_v11  ;;  %v97_v29 = vld [vmem:[#allocation5] sm:$0xff]  ;;  %v143_v30 = vld [vmem:[#allocation10 + $0x10] sm:$0xff]  ;;  %v142_v31 = vld [vmem:[#allocation10 + $0x8] sm:$0xff] }
  0x1e   :  { %123 = vmatpush.msra.mxu0 %v108_v8  ;;  %v141_v32 = vld [vmem:[#allocation10] sm:$0xff]  ;;  %v199_v33 = vld [vmem:[#allocation11 + $0x78] sm:$0xff]  ;;  %v198_v34 = vld [vmem:[#allocation11 + $0x70] sm:$0xff] }
  0x1f   :  { %166 = vmatpush.msra.mxu1 %v151_v13  ;;  %204 = vmatpush.msra.mxu2 %v199_v33  ;;  %v197_v35 = vld [vmem:[#allocation11 + $0x68] sm:$0xff]  ;;  %v196_v36 = vld [vmem:[#allocation11 + $0x60] sm:$0xff]  ;;  %v195_v37 = vld [vmem:[#allocation11 + $0x58] sm:$0xff] }
  0x20   :  { %124 = vmatpush.msra.mxu0 %v107_v10  ;;  %v194_v38 = vld [vmem:[#allocation11 + $0x50] sm:$0xff]  ;;  %v193_v39 = vld [vmem:[#allocation11 + $0x48] sm:$0xff]  ;;  %v192_v40 = vld [vmem:[#allocation11 + $0x40] sm:$0xff] }
  0x21   :  { %167 = vmatpush.msra.mxu1 %v150_v15  ;;  %205 = vmatpush.msra.mxu2 %v198_v34  ;;  %v191_v41 = vld [vmem:[#allocation11 + $0x38] sm:$0xff]  ;;  %v190_v42 = vld [vmem:[#allocation11 + $0x30] sm:$0xff]  ;;  %v189_v43 = vld [vmem:[#allocation11 + $0x28] sm:$0xff] }
  0x22   :  { %125 = vmatpush.msra.mxu0 %v106_v12  ;;  %v188_v44 = vld [vmem:[#allocation11 + $0x20] sm:$0xff]  ;;  %v187_v45 = vld [vmem:[#allocation11 + $0x18] sm:$0xff]  ;;  %v186_v51 = vld [vmem:[#allocation11 + $0x10] sm:$0xff] }
  0x23   :  { %168 = vmatpush.msra.mxu1 %v149_v17  ;;  %206 = vmatpush.msra.mxu2 %v197_v35  ;;  %v278_v46 = vld [vmem:[%s504_s3] ss:$0 sm:$0xff]  ;;  %v185_v52 = vld [vmem:[#allocation11 + $0x8] sm:$0xff]  ;;  %v184_v53 = vld [vmem:[#allocation11] sm:$0xff] }
  0x24   :  { %126 = vmatpush.msra.mxu0 %v105_v14  ;;  %v279_v54 = vld [vmem:[%s506_s5] ss:$0 sm:$0xff] }
  0x25   :  { %169 = vmatpush.msra.mxu1 %v148_v19  ;;  %207 = vmatpush.msra.mxu2 %v196_v36  ;;  %v280_v59 = vld [vmem:[%s508_s7] ss:$0 sm:$0xff]  ;;  %s259_s7 = sshll.u32 %s511_s10, 4  ;;  %s260_s7 = int_to_ptr.hbm [resolvable:$true] %s259_s7 }
  0x26   :  { %127 = vmatpush.msra.mxu0 %v104_v16  ;;  %v227_v0 = vld [vmem:[%s509_s8] sm:$0x1] }
  0x27   :  { %170 = vmatpush.msra.mxu1 %v147_v21  ;;  %208 = vmatpush.msra.mxu2 %v195_v37 }
  0x28   :  { %128 = vmatpush.msra.mxu0 %v103_v18 }
  0x29   :  { %171 = vmatpush.msra.mxu1 %v146_v23  ;;  %209 = vmatpush.msra.mxu2 %v194_v38 }
  0x2a   :  { %129 = vmatpush.msra.mxu0 %v102_v20 }
  0x2b   :  { %172 = vmatpush.msra.mxu1 %v145_v25  ;;  %210 = vmatpush.msra.mxu2 %v193_v39 }
  0x2c   :  { %130 = vmatpush.msra.mxu0 %v101_v22 }
  0x2d   :  { %173 = vmatpush.msra.mxu1 %v144_v27  ;;  %211 = vmatpush.msra.mxu2 %v192_v40 }
  0x2e   :  { %131 = vmatpush.msra.mxu0 %v100_v24 }
  0x2f   :  { %174 = vmatpush.msra.mxu1 %v143_v30  ;;  %212 = vmatpush.msra.mxu2 %v191_v41 }
  0x30   :  { %132 = vmatpush.msra.mxu0 %v99_v26 }
  0x31   :  { %175 = vmatpush.msra.mxu1 %v142_v31  ;;  %213 = vmatpush.msra.mxu2 %v190_v42 }
  0x32   :  { %133 = vmatpush.msra.mxu0 %v98_v28 }
  0x33   :  { %134 = vmatmul.f32.vlgmr.msra.gmra.mxu0 %v97_v29  ;;  %176 = vmatpush.msra.mxu1 %v141_v32 }
  0x34   :  { %214 = vmatpush.msra.mxu2 %v189_v43 }
  0x36   :  { %215 = vmatpush.msra.mxu2 %v188_v44 }
  0x38   :  { %216 = vmatpush.msra.mxu2 %v187_v45 }
  0x3a   :  { %217 = vmatpush.msra.mxu2 %v186_v51 }
  0x3c   :  { %218 = vmatpush.msra.mxu2 %v185_v52 }
  0x3e   :  { %219 = vmatpush.msra.mxu2 %v184_v53 }
  0xb0   :  { %v135_v47 = vpop.f32.mrf.mxu0 }
  0xb1   :  { %v136_v48 = vadd.f32 %v278_v46, %v135_v47 }
  0xb3   :  { %vm138_vm0 = vcmp.gt.f32.partialorder %v136_v48, 0.0  ;;  %v139_v49 = vmul.f32 0.01, %v136_v48 }
  0xb5   :  { %v140_v50 = vsel %vm138_vm0, %v136_v48, %v139_v49 }
  0xb6   :  { %177 = vmatmul.f32.vlgmr.msra.gmra.mxu1 %v140_v50 }
 0x133   :  { %v178_v55 = vpop.f32.mrf.mxu1 }
 0x134   :  { %v179_v56 = vadd.f32 %v279_v54, %v178_v55 }
 0x136   :  { %vm181_vm1 = vcmp.gt.f32.partialorder %v179_v56, 0.0  ;;  %v182_v57 = vmul.f32 0.01, %v179_v56 }
 0x138   :  { %v183_v58 = vsel %vm181_vm1, %v179_v56, %v182_v57 }
 0x139   :  { %220 = vmatmul.f32.vlgmr.msra.gmra.mxu2 %v183_v58 }
 0x1bc   :  { %v221_v60 = vpop.f32.mrf.mxu2 }
 0x1bd   :  { %v222_v61 = vadd.f32 %v280_v59, %v221_v60 }
 0x1bf   :  { %vm224_vm2 = vcmp.gt.f32.partialorder %v222_v61, 0.0  ;;  %v225_v62 = vmul.f32 0.01, %v222_v61 }
 0x1c1   :  { %v226_v63 = vsel %vm224_vm2, %v222_v61, %v225_v62 }
 0x1c2   :  { %245 = vmatpush.xpose.msra.mxu3 %v226_v63 }
 0x1c5   :  { %246 = vmatmul.f32.vlgmr.msra.gmra.mxu3 %v227_v0 }
 0x248   :  { %v247_v2 = vpop.f32.mrf.mxu3 }
 0x249   :  { %v248_v3 = vadd.f32 %v247_v2, %v229_v1 }
 0x24b   :  { %251 = vst.msk [vmem:[#allocation13] sm:$0x1] %vm250_vm3, %v248_v3 }
 0x24c   :  { %262 = dma.vmem_to_hbm [thread:$0]  %s258_s18, 16, %s260_s7, [#allocation7]  }
 0x24d   :  { %407 = dma.done.wait [#allocation7], 16  }
 0x24e   :  { %408 = vsyncadd [#allocation7], 4294967280 }
 0x24f   :  { %267 = vsyncpa [#allocation6], 1 }
 0x250   :  { %268 = vsyncpa [#allocation9], 1 }
 0x251   :  { %269 = vsyncpa [#allocation12], 1 }
 0x252   :  { %270 = vsyncpa [#allocation7], 1 }

</bundles_post_ra>
